<compile_context>
chip_gen: v6e
topology: v6e:2x2x1
jax: 0.10.0
libtpu: 0.0.40
codegen_flags: <defaults>
</compile_context>

<pallas_src>
import functools

import jax
import jax.numpy as jnp
from jax.experimental import pallas as pl
from jax.experimental.pallas import tpu as pltpu


def _adain_norm_kernel(x_ref, gb_ref, o_ref, *, hw, eps):
    # x_ref: (R, HW)   gb_ref: (R, 2) [gamma, beta]   o_ref: (R, HW)
    inv_n = 1.0 / float(hw)

    # Pass 1: mean (f32 accumulation).
    mean = jnp.sum(x_ref[...].astype(jnp.float32), axis=1, keepdims=True) * inv_n

    # Pass 2: centered variance (numerically safer than E[x^2] - mean^2).
    # Re-read x_ref rather than holding the f32 upcast live across passes.
    d = x_ref[...].astype(jnp.float32) - mean
    var = jnp.sum(d * d, axis=1, keepdims=True) * inv_n            # biased var
    inv_std = jax.lax.rsqrt(var + eps)

    gamma = gb_ref[:, 0:1].astype(jnp.float32)                     # (R, 1)
    beta = gb_ref[:, 1:2].astype(jnp.float32)                      # (R, 1)
    scale = (1.0 + gamma) * inv_std                                # (R, 1)
    shift = beta - mean * scale                                    # (R, 1)

    # Final fused pass: x*scale + shift (fresh load from the VMEM tile).
    o_ref[...] = (x_ref[...].astype(jnp.float32) * scale + shift).astype(o_ref.dtype)


def _round_up(a, b):
    return (a + b - 1) // b * b


def _vmem_capacity_bytes():
    try:
        cap = getattr(pltpu.get_tpu_info(), "vmem_capacity_bytes", None)
        if cap:
            return int(cap)
    except Exception:
        pass
    return 64 * 1024 * 1024  # conservative default (v7x per-TC)


def adain_pallas(x, s, fc_w, fc_b, *, eps=1e-5):
    """x: (N, C, H, W) NCHW; s: (N, style_dim); fc_w: (2C, style_dim); fc_b: (2C,)."""
    N, C, H, W = x.shape
    HW = H * W
    rows = N * C
    dtype = x.dtype
    itemsize = jnp.dtype(dtype).itemsize

    # --- Style FC hoisted out of the kernel: one GEMM for the whole batch. ---
    h = (s.astype(jnp.float32) @ fc_w.astype(jnp.float32).T
         + fc_b.astype(jnp.float32))                                # (N, 2C)
    gamma = h[:, :C].reshape(-1)                                    # (N*C,)
    beta = h[:, C:].reshape(-1)                                     # (N*C,)
    gb = jnp.stack([gamma, beta], axis=-1)                          # (N*C, 2)

    # --- Generation-aware VMEM budget. ---
    vmem_cap = _vmem_capacity_bytes()
    per_buf_cap = vmem_cap // 10          # ~6.4 MiB on v7x, ~12.8 MiB on v5e/v6e
    vmem_limit = int(vmem_cap * 0.7)

    # --- Row tile: multiple of the dtype's packed sublane tile, capped so
    #     double-buffered in+out tiles fit the budget, and further capped so
    #     the grid has >= ~4 steps (megacore sharding + pipelining). ---
    sublane = max(8, 32 // itemsize)      # 8 f32, 16 bf16, 32 int8/fp8
    bytes_per_row = HW * itemsize
    max_r = max(sublane, (per_buf_cap // max(bytes_per_row, 1)) // sublane * sublane)
    R = min(_round_up(rows, sublane), max_r)
    min_steps = 4
    r_for_steps = _round_up(pl.cdiv(rows, min_steps), sublane)
    R = max(sublane, min(R, r_for_steps))

    grid = (pl.cdiv(rows, R),)

    # Free reshape (contiguous NCHW) -> one row per (n, c) instance.
    x2 = x.reshape(rows, HW)

    out = pl.pallas_call(
        functools.partial(_adain_norm_kernel, hw=HW, eps=eps),
        out_shape=jax.ShapeDtypeStruct((rows, HW), dtype),
        grid_spec=pltpu.PrefetchScalarGridSpec(
            num_scalar_prefetch=0,
            grid=grid,
            in_specs=[
                pl.BlockSpec((R, HW), lambda i: (i, 0)),
                pl.BlockSpec((R, 2), lambda i: (i, 0)),
            ],
            out_specs=pl.BlockSpec((R, HW), lambda i: (i, 0)),
        ),
        compiler_params=pltpu.CompilerParams(
            dimension_semantics=("parallel",),
            vmem_limit_bytes=vmem_limit,
        ),
    )(x2, gb)

    return out.reshape(N, C, H, W)


def adain_reference(x, s, fc_w, fc_b, *, eps=1e-5):
    """Plain-JAX reference matching the PyTorch module."""
    h = s @ fc_w.T + fc_b                                           # (N, 2C)
    N, C = x.shape[0], x.shape[1]
    gamma = h[:, :C].reshape(N, C, 1, 1)
    beta = h[:, C:].reshape(N, C, 1, 1)
    mean = jnp.mean(x, axis=(2, 3), keepdims=True)
    var = jnp.mean((x - mean) ** 2, axis=(2, 3), keepdims=True)
    xn = (x - mean) / jnp.sqrt(var + eps)
    return (1.0 + gamma) * xn + beta


if __name__ == "__main__":
    # Small shapes consistent with the module's forward:
    #   x: (batch=2, num_features=4, 16, 16), s: (batch=2, style_dim=8)
    N, C, H, W = 2, 4, 16, 16
    style_dim = 8

    key = jax.random.PRNGKey(0)
    kx, ks, kw, kb = jax.random.split(key, 4)

    x = jax.random.normal(kx, (N, C, H, W), dtype=jnp.float32)
    s = jax.random.normal(ks, (N, style_dim), dtype=jnp.float32)
    # Deterministic synthetic fc params (nn.Linear(style_dim, 2C) shapes).
    fc_w = jax.random.normal(kw, (2 * C, style_dim), dtype=jnp.float32) * 0.1
    fc_b = jax.random.normal(kb, (2 * C,), dtype=jnp.float32) * 0.1

    out = adain_pallas(x, s, fc_w, fc_b)
    out = jax.block_until_ready(out)

    ref = adain_reference(x, s, fc_w, fc_b)
    assert out.shape == (N, C, H, W)
    assert jnp.allclose(out, ref, atol=1e-4, rtol=1e-4), (
        float(jnp.max(jnp.abs(out - ref))))

    print("KERNEL_OK")
</pallas_src>

<mosaic_0001>
module attributes {stable_mosaic.version = 11 : i64} {
  func.func @_adain_norm_kernel(%arg0: i32, %arg1: memref<8x256xf32, #tpu.memory_space<vmem>>, %arg2: memref<8x2xf32, #tpu.memory_space<vmem>>, %arg3: memref<8x256xf32, #tpu.memory_space<vmem>>) attributes {dimension_semantics = [#tpu.dimension_semantics<parallel>], iteration_bounds = array<i64: 1>, scalar_prefetch = 0 : i64, scratch_operands = 0 : i64, tpu.core_type = #tpu.core_type<tc>, window_params = [{transform_indices = @transform_0, window_bounds = array<i64: 8, 256>}, {transform_indices = @transform_1, window_bounds = array<i64: 8, 2>}, {transform_indices = @transform_2, window_bounds = array<i64: 8, 256>}]} {
    %c0 = arith.constant 0 : index
    %c0_0 = arith.constant 0 : index
    %0 = vector.load %arg1[%c0, %c0_0] : memref<8x256xf32, #tpu.memory_space<vmem>>, vector<8x256xf32>
    %cst = arith.constant dense<0.000000e+00> : vector<8xf32>
    %1 = vector.multi_reduction <add>, %0, %cst [1] : vector<8x256xf32> to vector<8xf32>
    %2 = vector.shape_cast %1 : vector<8xf32> to vector<8x1xf32>
    %cst_1 = arith.constant 3.906250e-03 : f32
    %3 = vector.broadcast %cst_1 : f32 to vector<8x1xf32>
    %4 = arith.mulf %2, %3 : vector<8x1xf32>
    %c0_2 = arith.constant 0 : index
    %c0_3 = arith.constant 0 : index
    %5 = vector.load %arg1[%c0_2, %c0_3] : memref<8x256xf32, #tpu.memory_space<vmem>>, vector<8x256xf32>
    %6 = vector.broadcast %4 : vector<8x1xf32> to vector<8x256xf32>
    %7 = arith.subf %5, %6 : vector<8x256xf32>
    %8 = arith.mulf %7, %7 : vector<8x256xf32>
    %cst_4 = arith.constant dense<0.000000e+00> : vector<8xf32>
    %9 = vector.multi_reduction <add>, %8, %cst_4 [1] : vector<8x256xf32> to vector<8xf32>
    %10 = vector.shape_cast %9 : vector<8xf32> to vector<8x1xf32>
    %cst_5 = arith.constant 3.906250e-03 : f32
    %11 = vector.broadcast %cst_5 : f32 to vector<8x1xf32>
    %12 = arith.mulf %10, %11 : vector<8x1xf32>
    %cst_6 = arith.constant 9.99999974E-6 : f32
    %13 = vector.broadcast %cst_6 : f32 to vector<8x1xf32>
    %14 = arith.addf %12, %13 : vector<8x1xf32>
    %15 = math.rsqrt %14 : vector<8x1xf32>
    %c0_7 = arith.constant 0 : index
    %c0_8 = arith.constant 0 : index
    %16 = vector.load %arg2[%c0_7, %c0_8] : memref<8x2xf32, #tpu.memory_space<vmem>>, vector<8x1xf32>
    %c0_9 = arith.constant 0 : index
    %c1 = arith.constant 1 : index
    %17 = vector.load %arg2[%c0_9, %c1] : memref<8x2xf32, #tpu.memory_space<vmem>>, vector<8x1xf32>
    %cst_10 = arith.constant 1.000000e+00 : f32
    %18 = vector.broadcast %cst_10 : f32 to vector<8x1xf32>
    %19 = arith.addf %18, %16 : vector<8x1xf32>
    %20 = arith.mulf %19, %15 : vector<8x1xf32>
    %21 = arith.mulf %4, %20 : vector<8x1xf32>
    %22 = arith.subf %17, %21 : vector<8x1xf32>
    %c0_11 = arith.constant 0 : index
    %c0_12 = arith.constant 0 : index
    %23 = vector.load %arg1[%c0_11, %c0_12] : memref<8x256xf32, #tpu.memory_space<vmem>>, vector<8x256xf32>
    %24 = vector.broadcast %20 : vector<8x1xf32> to vector<8x256xf32>
    %25 = arith.mulf %23, %24 : vector<8x256xf32>
    %26 = vector.broadcast %22 : vector<8x1xf32> to vector<8x256xf32>
    %27 = arith.addf %25, %26 : vector<8x256xf32>
    %c0_13 = arith.constant 0 : index
    %c0_14 = arith.constant 0 : index
    %28 = vector.load %arg3[%c0_13, %c0_14] : memref<8x256xf32, #tpu.memory_space<vmem>>, vector<8x256xf32>
    tpu.vector_store %arg3[%c0_13, %c0_14], %27 {strides = array<i32>} : memref<8x256xf32, #tpu.memory_space<vmem>>, vector<8x256xf32>,
    return
  }
  func.func @transform_0(%arg0: i32) -> (i32, i32) {
    %c0_i32 = arith.constant 0 : i32
    %c0_i32_0 = arith.constant 0 : i32
    return %arg0, %c0_i32 : i32, i32
  }
  func.func @transform_1(%arg0: i32) -> (i32, i32) {
    %c0_i32 = arith.constant 0 : i32
    %c0_i32_0 = arith.constant 0 : i32
    return %arg0, %c0_i32 : i32, i32
  }
  func.func @transform_2(%arg0: i32) -> (i32, i32) {
    %c0_i32 = arith.constant 0 : i32
    %c0_i32_0 = arith.constant 0 : i32
    return %arg0, %c0_i32 : i32, i32
  }
}

</mosaic_0001>

<bundles_post_ra>
// kernel: tpu_custom_call.1
= control target key start
LH: loop header
LB: loop body
LE: loop exit
PB: predicated region body
PF: predicated region fallthrough
CT: control target
= control target key end

     0   :  { %7 = vsyncpa [#allocation3], 0  ;;  %s162_s0 = inlined_call_operand.hbm [shape: f32[8,256], index: 0, kind: input, shape index: {}]   ;;  %s163_s1 = inlined_call_operand.vmem [shape: f32[8,2], index: 1, kind: input, shape index: {}]   ;;  %s164_s2 = inlined_call_operand.hbm [shape: f32[8,256], index: 2, kind: output, shape index: {}]  }
   0x1   :  { %8 = vsyncpa [#allocation4], 0  ;;  %s133_s9 = smov [#allocation2]  }
   0x2   :  { %s15_s10 = sshll.u32 %s133_s9, 4  ;;  %s16_s10 = int_to_ptr.vmem [resolvable:$true] %s15_s10 }
   0x3   :  { %s97_s11 = scalar_lea.vmem %s16_s10, 256  ;;  %p102_p1 = scmp.lt.s32.totalorder %s16_s10, %s16_s10 }
   0x4   :  { %p98_p0 = scmp.ne.s32.totalorder %s16_s10, %s97_s11  ;;  %p103_p2 = scmp.lt.s32.totalorder %s97_s11, %s97_s11 }
   0x6   :  { %p104_p3 = por %p103_p2, %p102_p1 }
   0x8   :  { %p105_p4 = pnand %p104_p3, %p98_p0 }
   0xa   :  { %108 = shalt.err (!%p105_p4)
}
   0xb   :  { %18 = dma.hbm_to_vmem [thread:$0]  %s162_s0, 256, %s16_s10, [#allocation3]  }
   0xc   :  { %129 = dma.done.wait [#allocation3], 256  }
   0xd   :  { %130 = vsyncadd [#allocation3], 4294967040  ;;  %v24_v0 = vld [vmem:[#allocation2] sm:$0xff]  ;;  %v25_v1 = vld [vmem:[#allocation2 + $0x8] sm:$0xff]  ;;  %v134_v10 = vmov 0   ;;  %v135_v14 = vmov 1  }
   0xe   :  { %v26_v2 = vadd.f32 %v25_v1, %v24_v0  ;;  %85 = vset.pattern.permute.xlu1 %v134_v10  ;;  %86 = vset.pattern.permute.xlu0 %v135_v14  ;;  %v40_v15 = vld [vmem:[%s163_s1] sm:$0xff]  ;;  %s136_s15 = smov 1   ;;  %s137_s16 = smov [#allocation5]  }
   0xf   :  { %v41_v16 = vadd.f32 1.0, %v40_v15  ;;  %s71_s17 = sshll.u32 %s137_s16, 4  ;;  %s72_s17 = int_to_ptr.vmem [resolvable:$true] %s71_s17 }
  0x10   :  { %27 = vadd.xlane.f32.xlu0 %v26_v2  ;;  %s109_s1 = scalar_lea.vmem %s72_s17, 256  ;;  %p114_p6 = scmp.lt.s32.totalorder %s72_s17, %s72_s17 }
  0x11   :  { %p110_p5 = scmp.ne.s32.totalorder %s72_s17, %s109_s1  ;;  %p115_p7 = scmp.lt.s32.totalorder %s109_s1, %s109_s1 }
  0x13   :  { %p116_p8 = por %p115_p7, %p114_p6 }
  0x15   :  { %p117_p9 = pnand %p116_p8, %p110_p5 }
  0x99   :  { %v28_v3 = vpop.xlane.xlu0 %27 }
  0x9a   :  { %v29_v4 = vmul.f32 0.00390625, %v28_v3 }
  0x9c   :  { %v30_v5 = vsub.f32 %v24_v0, %v29_v4  ;;  %v31_v6 = vsub.f32 %v25_v1, %v29_v4 }
  0x9e   :  { %v32_v7 = vmul.f32 %v30_v5, %v30_v5  ;;  %v33_v8 = vmul.f32 %v31_v6, %v31_v6 }
  0xa0   :  { %v34_v9 = vadd.f32 %v33_v8, %v32_v7 }
  0xa2   :  { %35 = vadd.xlane.f32.xlu0 %v34_v9 }
 0x12b   :  { %v36_v11 = vpop.xlane.xlu0 %35 }
 0x12c   :  { %v37_v12 = vmul.f32 0.00390625, %v36_v11 }
 0x12e   :  { %v38_v13 = vadd.f32 1e-05, %v37_v12 }
 0x130   :  { %87 = vrsqrt.f32 %v38_v13 }
 0x13d   :  { %v88_v17 = vpop.eup %87 }
 0x13e   :  { %v42_v18 = vmul.f32 %v88_v17, %v41_v16 }
 0x140   :  { %v43_v19 = vmul.f32 %v42_v18, %v29_v4 }
 0x142   :  { %45 = vrot.lane.b32.xlu1 %v43_v19, %s136_s15 }
 0x146   :  { %51 = vperm.xlu1 %85, %v42_v18  }
 0x1b4   :  { %v46_v20 = vpop.permute.xlu1 %45 }
 0x1b5   :  { %v48_v21 = vsub.f32 %v40_v15, %v46_v20 }
 0x1b7   :  { %58 = vperm.xlu0 %86, %v48_v21  }
 0x1c1   :  { %v52_v22 = vpop.permute.xlu1 %51 }
 0x1c2   :  { %v54_v23 = vmul.f32 %v52_v22, %v24_v0  ;;  %v55_v24 = vmul.f32 %v52_v22, %v25_v1 }
 0x232   :  { %v59_v25 = vpop.permute.xlu0 %58 }
 0x233   :  { %v61_v26 = vadd.f32 %v59_v25, %v54_v23  ;;  %v62_v27 = vadd.f32 %v59_v25, %v55_v24 }
 0x235   :  { %63 = vst [vmem:[#allocation5] sm:$0xff] %v61_v26  ;;  %64 = vst [vmem:[#allocation5 + $0x8] sm:$0xff] %v62_v27 }
 0x236   :  { %120 = shalt.err (!%p117_p9)
}
 0x237   :  { %74 = dma.vmem_to_hbm [thread:$0]  %s72_s17, 256, %s164_s2, [#allocation4]  }
 0x238   :  { %131 = dma.done.wait [#allocation4], 256  }
 0x239   :  { %132 = vsyncadd [#allocation4], 4294967040 }
 0x23a   :  { %78 = vsyncpa [#allocation3], 1 }
 0x23b   :  { %79 = vsyncpa [#allocation4], 1 }

</bundles_post_ra>
